<compile_context>
chip_gen: v6e
topology: v6e:2x2x1
jax: 0.10.0
libtpu: 0.0.40
codegen_flags: <defaults>
</compile_context>

<pallas_src>
import functools

import jax
import jax.numpy as jnp
from jax.experimental import pallas as pl
from jax.experimental.pallas import tpu as pltpu

LANE = 128      # TPU lane width (last-dim tile)
SUBLANE = 8     # f32 sublane tile (second-to-last dim)


def _round_up(x, m):
    return ((x + m - 1) // m) * m


# ------------------------------- Pallas kernel ------------------------------ #

def _conv_bn_relu_kernel(x_ref, w_ref, b_ref, o_ref, *,
                         ksize, tile_rows, wo_p, cin):
    """One grid step = `tile_rows` output rows of one image x one Cout tile.

    x_ref : (1, Hp, Wp, Cin)         f32   whole padded image (VMEM-resident)
    w_ref : (K*K, Cin, Cout_t)       bf16  conv weight with BN scale pre-folded
    b_ref : (1, Cout_t)              f32   folded bias (conv bias + BN shift)
    o_ref : (tile_rows*Wo_p, Cout_t) f32
    """
    h = pl.program_id(1)
    row0 = pl.multiple_of(h * tile_rows, tile_rows)   # first output row of this tile
    cout_t = o_ref.shape[-1]
    tm = tile_rows * wo_p

    acc = jnp.zeros((tm, cout_t), jnp.float32)
    # Implicit im2col: the reduction over the K*K kernel taps happens in-register;
    # each tap is a shifted window of the VMEM-resident image -> one MXU GEMM.
    for dy in range(ksize):
        for dx in range(ksize):
            sub = x_ref[0, pl.ds(row0 + dy, tile_rows), pl.ds(dx, wo_p), :]
            lhs = sub.reshape(tm, cin).astype(jnp.bfloat16)
            acc += jnp.dot(lhs, w_ref[dy * ksize + dx],
                           preferred_element_type=jnp.float32)

    # BN scale already folded into the weights; only bias + ReLU remain.
    o_ref[...] = jnp.maximum(acc + b_ref[...], 0.0).astype(o_ref.dtype)


# ------------------------------- tiling helpers ----------------------------- #

def _vmem_need_bytes(tile_rows, ho, wo_p, cin, cout_t, ksize):
    pad = ksize // 2
    hp = _round_up(ho, tile_rows) + 2 * pad
    wp = wo_p + 2 * pad
    tm = tile_rows * wo_p
    return (2 * hp * wp * cin * 4                    # f32 image block, double-buffered
            + 2 * ksize * ksize * cin * cout_t * 2   # bf16 weight block x2
            + 2 * cout_t * 4                         # bias blocks x2
            + 2 * tm * cout_t * 4                    # f32 output block x2
            + tm * cout_t * 4                        # f32 accumulator
            + tm * cin * 4)                          # lhs staging slack


def _pick_tile_rows(ho, wo_p, cin, cout_t, ksize, vmem_budget):
    """Largest row-tile that fits the VMEM budget; prefer >=2 row tiles so the
    pipeline has steps to overlap, and prefer exact divisors of Ho (no waste)."""
    feasible = [t for t in (128, 64, 32, 16, 8, 4, 2, 1)
                if t <= ho and
                _vmem_need_bytes(t, ho, wo_p, cin, cout_t, ksize) <= vmem_budget]
    if not feasible:
        return 1
    for t in feasible:                       # exact divisor and >= 2 row tiles
        if ho % t == 0 and ho // t >= 2:
            return t
    for t in feasible:                       # >= 2 row tiles (padded rows cropped)
        if pl.cdiv(ho, t) >= 2:
            return t
    return feasible[0]


# --------------------------------- wrapper ---------------------------------- #

def conv_bn_relu(x_nhwc, w_hwio, conv_bias, gamma, beta, running_mean, running_var,
                 *, ksize=3, eps=1e-5):
    """Fused Conv2d(stride 1, pad k//2) + folded BatchNorm + ReLU, NHWC in/out."""
    B, H, W, Cin = x_nhwc.shape
    Cout = w_hwio.shape[-1]
    pad = ksize // 2
    Ho, Wo = H, W                                      # stride 1, 'same' padding

    # Lane/sublane friendly padded sizes (lane-dense stores, tile-aligned reshapes).
    cout_p = _round_up(Cout, LANE)
    wo_p = _round_up(Wo, SUBLANE)
    if cout_p <= 256:
        cout_t = cout_p
    elif cout_p % 256 == 0:
        cout_t = 256
    else:
        cout_t = LANE
    n_j = cout_p // cout_t

    # VMEM-budget aware row tiling (budget ~ half of v7x's 64 MiB per-core VMEM).
    vmem_budget = 32 * 1024 * 1024
    tile_rows = _pick_tile_rows(Ho, wo_p, Cin, cout_t, ksize, vmem_budget)
    ho_p = _round_up(Ho, tile_rows)
    n_h = ho_p // tile_rows
    hp = ho_p + 2 * pad
    wp = wo_p + 2 * pad
    tm = tile_rows * wo_p
    need = _vmem_need_bytes(tile_rows, Ho, wo_p, Cin, cout_t, ksize)
    vmem_limit = int(min(64 * 1024 * 1024, max(32 * 1024 * 1024, 2 * need)))

    # Spatially padded image (conv zero padding + alignment padding; alignment
    # rows/cols are cropped after the kernel).
    xp = jnp.pad(x_nhwc.astype(jnp.float32),
                 ((0, 0), (pad, pad + ho_p - Ho), (pad, pad + wo_p - Wo), (0, 0)))

    # Fold BN into the conv: per-channel scale goes into the weights (bf16 on the
    # MXU), conv bias + BN shift become a single f32 bias added in the epilogue.
    scale = gamma / jnp.sqrt(running_var + eps)
    bias = (conv_bias - running_mean) * scale + beta
    w_folded = w_hwio.astype(jnp.float32) * scale                  # HWIO * (Cout,)
    w_p = jnp.pad(w_folded, ((0, 0), (0, 0), (0, 0), (0, cout_p - Cout)))
    w3 = w_p.reshape(ksize * ksize, Cin, cout_p).astype(jnp.bfloat16)
    bias_p = jnp.pad(bias, (0, cout_p - Cout)).reshape(1, cout_p).astype(jnp.float32)

    kernel = functools.partial(_conv_bn_relu_kernel, ksize=ksize,
                               tile_rows=tile_rows, wo_p=wo_p, cin=Cin)

    out2d = pl.pallas_call(
        kernel,
        out_shape=jax.ShapeDtypeStruct((B * ho_p * wo_p, cout_p), jnp.float32),
        grid=(B, n_h, n_j),
        in_specs=[
            # Whole padded image of batch element b; index constant over (h, j), so it
            # is DMA'd into VMEM once per image (no K*K patch amplification in HBM).
            pl.BlockSpec((1, hp, wp, Cin), lambda b, h, j: (b, 0, 0, 0)),
            pl.BlockSpec((ksize * ksize, Cin, cout_t), lambda b, h, j: (0, 0, j)),
            pl.BlockSpec((1, cout_t), lambda b, h, j: (0, j)),
        ],
        # Lane-dense (last dim multiple of 128) 2-D output blocks.
        out_specs=pl.BlockSpec((tm, cout_t), lambda b, h, j: (b * n_h + h, j)),
        compiler_params=pltpu.CompilerParams(
            dimension_semantics=("parallel", "parallel", "parallel"),
            vmem_limit_bytes=vmem_limit,
        ),
    )(xp, w3, bias_p)

    out = out2d.reshape(B, ho_p, wo_p, cout_p)[:, :Ho, :Wo, :Cout]
    return out


def cbn_block(x_nchw, params, *, ksize=3, eps=1e-5):
    """PyTorch CBN_Block.forward: Conv2d(k, stride 1, pad k//2) -> BatchNorm2d -> ReLU."""
    x = jnp.transpose(x_nchw, (0, 2, 3, 1))                     # NCHW -> NHWC
    y = conv_bn_relu(x, params["w"], params["conv_bias"], params["gamma"],
                     params["beta"], params["running_mean"], params["running_var"],
                     ksize=ksize, eps=eps)
    return jnp.transpose(y, (0, 3, 1, 2)).astype(x_nchw.dtype)  # back to NCHW


# ------------------------------- references ---------------------------------- #

def cbn_block_reference_bf16(x_nchw, params, *, ksize=3, eps=1e-5):
    """Pure-JAX reference using the SAME bf16-rounded GEMM operands as the kernel."""
    x = jnp.transpose(x_nchw, (0, 2, 3, 1)).astype(jnp.bfloat16).astype(jnp.float32)
    scale = params["gamma"] / jnp.sqrt(params["running_var"] + eps)
    w = (params["w"].astype(jnp.float32) * scale).astype(jnp.bfloat16).astype(jnp.float32)
    y = jax.lax.conv_general_dilated(
        x, w, window_strides=(1, 1), padding="SAME",
        dimension_numbers=("NHWC", "HWIO", "NHWC"),
        precision=jax.lax.Precision.HIGHEST)
    bias = (params["conv_bias"] - params["running_mean"]) * scale + params["beta"]
    y = jnp.maximum(y + bias, 0.0)
    return jnp.transpose(y, (0, 3, 1, 2))


def cbn_block_reference_f32(x_nchw, params, *, ksize=3, eps=1e-5):
    """Exact f32 reference of the PyTorch module (inference-mode BatchNorm)."""
    x = jnp.transpose(x_nchw, (0, 2, 3, 1)).astype(jnp.float32)
    y = jax.lax.conv_general_dilated(
        x, params["w"].astype(jnp.float32), window_strides=(1, 1), padding="SAME",
        dimension_numbers=("NHWC", "HWIO", "NHWC"),
        precision=jax.lax.Precision.HIGHEST)
    y = y + params["conv_bias"]
    scale = params["gamma"] / jnp.sqrt(params["running_var"] + eps)
    y = (y - params["running_mean"]) * scale + params["beta"]
    y = jnp.maximum(y, 0.0)
    return jnp.transpose(y, (0, 3, 1, 2))


# ----------------------------- parameter init -------------------------------- #

def init_cbn_block(key, in_ch, out_ch, ksize=3):
    kw, kb, kg, kbe, km, kv = jax.random.split(key, 6)
    fan_in = ksize * ksize * in_ch
    bound = fan_in ** -0.5
    w = jax.random.uniform(kw, (ksize, ksize, in_ch, out_ch), jnp.float32, -bound, bound)
    conv_bias = jax.random.uniform(kb, (out_ch,), jnp.float32, -bound, bound)
    # BatchNorm params / running stats (perturbed so the folded scale/bias path is
    # actually exercised by the correctness check).
    gamma = 1.0 + 0.1 * jax.random.normal(kg, (out_ch,), jnp.float32)
    beta = 0.1 * jax.random.normal(kbe, (out_ch,), jnp.float32)
    running_mean = 0.1 * jax.random.normal(km, (out_ch,), jnp.float32)
    running_var = jax.random.uniform(kv, (out_ch,), jnp.float32, 0.5, 1.5)
    return dict(w=w, conv_bias=conv_bias, gamma=gamma, beta=beta,
                running_mean=running_mean, running_var=running_var)


# ----------------------------------- main ------------------------------------ #

if __name__ == "__main__":
    B, IN_CH, OUT_CH, H, W = 2, 4, 8, 16, 16
    KSIZE = 3

    key = jax.random.PRNGKey(0)
    k_params, k_x = jax.random.split(key)
    params = init_cbn_block(k_params, IN_CH, OUT_CH, KSIZE)
    x = jax.random.normal(k_x, (B, IN_CH, H, W), jnp.float32)

    y = jax.jit(functools.partial(cbn_block, ksize=KSIZE))(x, params)
    jax.block_until_ready(y)

    assert y.shape == (B, OUT_CH, H, W), y.shape
    assert bool(jnp.all(jnp.isfinite(y)))

    # Tight check vs a reference that mirrors the kernel's bf16 operand rounding.
    y_ref = cbn_block_reference_bf16(x, params, ksize=KSIZE)
    max_err = float(jnp.max(jnp.abs(y - y_ref)))
    assert max_err < 1e-2, f"mismatch vs bf16-rounded reference, max |err| = {max_err}"

    # Loose sanity check vs the exact f32 semantics of the PyTorch module.
    y_f32 = cbn_block_reference_f32(x, params, ksize=KSIZE)
    max_err_f32 = float(jnp.max(jnp.abs(y - y_f32)))
    assert max_err_f32 < 1e-1, f"mismatch vs f32 reference, max |err| = {max_err_f32}"

    print("KERNEL_OK")
</pallas_src>

<mosaic_0001>
module attributes {stable_mosaic.version = 11 : i64} {
  func.func @_conv_bn_relu_kernel(%arg0: i32, %arg1: i32, %arg2: i32, %arg3: memref<1x18x18x4xf32, #tpu.memory_space<vmem>>, %arg4: memref<9x4x128xbf16, #tpu.memory_space<vmem>>, %arg5: memref<1x128xf32, #tpu.memory_space<vmem>>, %arg6: memref<128x128xf32, #tpu.memory_space<vmem>>) attributes {dimension_semantics = [#tpu.dimension_semantics<parallel>, #tpu.dimension_semantics<parallel>, #tpu.dimension_semantics<parallel>], iteration_bounds = array<i64: 2, 2, 1>, scalar_prefetch = 0 : i64, scratch_operands = 0 : i64, tpu.core_type = #tpu.core_type<tc>, window_params = [{transform_indices = @transform_0, window_bounds = array<i64: 1, 18, 18, 4>}, {transform_indices = @transform_1, window_bounds = array<i64: 9, 4, 128>}, {transform_indices = @transform_2, window_bounds = array<i64: 1, 128>}, {transform_indices = @transform_3, window_bounds = array<i64: 128, 128>}]} {
    %c8_i32 = arith.constant 8 : i32
    %0 = arith.muli %arg1, %c8_i32 : i32
    %1 = tpu.assume_multiple %0, 8 : i32
    %cst = arith.constant 0.000000e+00 : f32
    %2 = vector.broadcast %cst : f32 to vector<128x128xf32>
    %c0_i32 = arith.constant 0 : i32
    %3 = arith.addi %1, %c0_i32 : i32
    %c0 = arith.constant 0 : index
    %4 = arith.index_cast %3 : i32 to index
    %c0_0 = arith.constant 0 : index
    %c0_1 = arith.constant 0 : index
    %5 = vector.load %arg3[%c0, %4, %c0_0, %c0_1] : memref<1x18x18x4xf32, #tpu.memory_space<vmem>>, vector<1x8x16x4xf32>
    %6 = vector.shape_cast %5 : vector<1x8x16x4xf32> to vector<8x16x4xf32>
    %7 = vector.shape_cast %6 : vector<8x16x4xf32> to vector<128x4xf32>
    %8 = arith.truncf %7 : vector<128x4xf32> to vector<128x4xbf16>
    %c0_2 = arith.constant 0 : index
    %c0_3 = arith.constant 0 : index
    %c0_4 = arith.constant 0 : index
    %9 = vector.load %arg4[%c0_2, %c0_3, %c0_4] : memref<9x4x128xbf16, #tpu.memory_space<vmem>>, vector<1x4x128xbf16>
    %10 = vector.shape_cast %9 : vector<1x4x128xbf16> to vector<4x128xbf16>
    %cst_5 = arith.constant dense<0.000000e+00> : vector<128x128xf32>
    %11 = tpu.matmul %8, %10, %cst_5 {dimension_numbers = #tpu.dot_dimension_numbers<[1], [0], [0], [1], [0, 0, 1, 1], [], []>} : vector<128x4xbf16>, vector<4x128xbf16>, vector<128x128xf32> -> vector<128x128xf32>
    %12 = arith.addf %2, %11 : vector<128x128xf32>
    %c0_i32_6 = arith.constant 0 : i32
    %13 = arith.addi %1, %c0_i32_6 : i32
    %c0_7 = arith.constant 0 : index
    %14 = arith.index_cast %13 : i32 to index
    %c1 = arith.constant 1 : index
    %c0_8 = arith.constant 0 : index
    %15 = vector.load %arg3[%c0_7, %14, %c1, %c0_8] : memref<1x18x18x4xf32, #tpu.memory_space<vmem>>, vector<1x8x16x4xf32>
    %16 = vector.shape_cast %15 : vector<1x8x16x4xf32> to vector<8x16x4xf32>
    %17 = vector.shape_cast %16 : vector<8x16x4xf32> to vector<128x4xf32>
    %18 = arith.truncf %17 : vector<128x4xf32> to vector<128x4xbf16>
    %c1_9 = arith.constant 1 : index
    %c0_10 = arith.constant 0 : index
    %c0_11 = arith.constant 0 : index
    %19 = vector.load %arg4[%c1_9, %c0_10, %c0_11] : memref<9x4x128xbf16, #tpu.memory_space<vmem>>, vector<1x4x128xbf16>
    %20 = vector.shape_cast %19 : vector<1x4x128xbf16> to vector<4x128xbf16>
    %cst_12 = arith.constant dense<0.000000e+00> : vector<128x128xf32>
    %21 = tpu.matmul %18, %20, %cst_12 {dimension_numbers = #tpu.dot_dimension_numbers<[1], [0], [0], [1], [0, 0, 1, 1], [], []>} : vector<128x4xbf16>, vector<4x128xbf16>, vector<128x128xf32> -> vector<128x128xf32>
    %22 = arith.addf %12, %21 : vector<128x128xf32>
    %c0_i32_13 = arith.constant 0 : i32
    %23 = arith.addi %1, %c0_i32_13 : i32
    %c0_14 = arith.constant 0 : index
    %24 = arith.index_cast %23 : i32 to index
    %c2 = arith.constant 2 : index
    %c0_15 = arith.constant 0 : index
    %25 = vector.load %arg3[%c0_14, %24, %c2, %c0_15] : memref<1x18x18x4xf32, #tpu.memory_space<vmem>>, vector<1x8x16x4xf32>
    %26 = vector.shape_cast %25 : vector<1x8x16x4xf32> to vector<8x16x4xf32>
    %27 = vector.shape_cast %26 : vector<8x16x4xf32> to vector<128x4xf32>
    %28 = arith.truncf %27 : vector<128x4xf32> to vector<128x4xbf16>
    %c2_16 = arith.constant 2 : index
    %c0_17 = arith.constant 0 : index
    %c0_18 = arith.constant 0 : index
    %29 = vector.load %arg4[%c2_16, %c0_17, %c0_18] : memref<9x4x128xbf16, #tpu.memory_space<vmem>>, vector<1x4x128xbf16>
    %30 = vector.shape_cast %29 : vector<1x4x128xbf16> to vector<4x128xbf16>
    %cst_19 = arith.constant dense<0.000000e+00> : vector<128x128xf32>
    %31 = tpu.matmul %28, %30, %cst_19 {dimension_numbers = #tpu.dot_dimension_numbers<[1], [0], [0], [1], [0, 0, 1, 1], [], []>} : vector<128x4xbf16>, vector<4x128xbf16>, vector<128x128xf32> -> vector<128x128xf32>
    %32 = arith.addf %22, %31 : vector<128x128xf32>
    %c1_i32 = arith.constant 1 : i32
    %33 = arith.addi %1, %c1_i32 : i32
    %c0_20 = arith.constant 0 : index
    %34 = arith.index_cast %33 : i32 to index
    %c0_21 = arith.constant 0 : index
    %c0_22 = arith.constant 0 : index
    %35 = vector.load %arg3[%c0_20, %34, %c0_21, %c0_22] : memref<1x18x18x4xf32, #tpu.memory_space<vmem>>, vector<1x8x16x4xf32>
    %36 = vector.shape_cast %35 : vector<1x8x16x4xf32> to vector<8x16x4xf32>
    %37 = vector.shape_cast %36 : vector<8x16x4xf32> to vector<128x4xf32>
    %38 = arith.truncf %37 : vector<128x4xf32> to vector<128x4xbf16>
    %c3 = arith.constant 3 : index
    %c0_23 = arith.constant 0 : index
    %c0_24 = arith.constant 0 : index
    %39 = vector.load %arg4[%c3, %c0_23, %c0_24] : memref<9x4x128xbf16, #tpu.memory_space<vmem>>, vector<1x4x128xbf16>
    %40 = vector.shape_cast %39 : vector<1x4x128xbf16> to vector<4x128xbf16>
    %cst_25 = arith.constant dense<0.000000e+00> : vector<128x128xf32>
    %41 = tpu.matmul %38, %40, %cst_25 {dimension_numbers = #tpu.dot_dimension_numbers<[1], [0], [0], [1], [0, 0, 1, 1], [], []>} : vector<128x4xbf16>, vector<4x128xbf16>, vector<128x128xf32> -> vector<128x128xf32>
    %42 = arith.addf %32, %41 : vector<128x128xf32>
    %c1_i32_26 = arith.constant 1 : i32
    %43 = arith.addi %1, %c1_i32_26 : i32
    %c0_27 = arith.constant 0 : index
    %44 = arith.index_cast %43 : i32 to index
    %c1_28 = arith.constant 1 : index
    %c0_29 = arith.constant 0 : index
    %45 = vector.load %arg3[%c0_27, %44, %c1_28, %c0_29] : memref<1x18x18x4xf32, #tpu.memory_space<vmem>>, vector<1x8x16x4xf32>
    %46 = vector.shape_cast %45 : vector<1x8x16x4xf32> to vector<8x16x4xf32>
    %47 = vector.shape_cast %46 : vector<8x16x4xf32> to vector<128x4xf32>
    %48 = arith.truncf %47 : vector<128x4xf32> to vector<128x4xbf16>
    %c4 = arith.constant 4 : index
    %c0_30 = arith.constant 0 : index
    %c0_31 = arith.constant 0 : index
    %49 = vector.load %arg4[%c4, %c0_30, %c0_31] : memref<9x4x128xbf16, #tpu.memory_space<vmem>>, vector<1x4x128xbf16>
    %50 = vector.shape_cast %49 : vector<1x4x128xbf16> to vector<4x128xbf16>
    %cst_32 = arith.constant dense<0.000000e+00> : vector<128x128xf32>
    %51 = tpu.matmul %48, %50, %cst_32 {dimension_numbers = #tpu.dot_dimension_numbers<[1], [0], [0], [1], [0, 0, 1, 1], [], []>} : vector<128x4xbf16>, vector<4x128xbf16>, vector<128x128xf32> -> vector<128x128xf32>
    %52 = arith.addf %42, %51 : vector<128x128xf32>
    %c1_i32_33 = arith.constant 1 : i32
    %53 = arith.addi %1, %c1_i32_33 : i32
    %c0_34 = arith.constant 0 : index
    %54 = arith.index_cast %53 : i32 to index
    %c2_35 = arith.constant 2 : index
    %c0_36 = arith.constant 0 : index
    %55 = vector.load %arg3[%c0_34, %54, %c2_35, %c0_36] : memref<1x18x18x4xf32, #tpu.memory_space<vmem>>, vector<1x8x16x4xf32>
    %56 = vector.shape_cast %55 : vector<1x8x16x4xf32> to vector<8x16x4xf32>
    %57 = vector.shape_cast %56 : vector<8x16x4xf32> to vector<128x4xf32>
    %58 = arith.truncf %57 : vector<128x4xf32> to vector<128x4xbf16>
    %c5 = arith.constant 5 : index
    %c0_37 = arith.constant 0 : index
    %c0_38 = arith.constant 0 : index
    %59 = vector.load %arg4[%c5, %c0_37, %c0_38] : memref<9x4x128xbf16, #tpu.memory_space<vmem>>, vector<1x4x128xbf16>
    %60 = vector.shape_cast %59 : vector<1x4x128xbf16> to vector<4x128xbf16>
    %cst_39 = arith.constant dense<0.000000e+00> : vector<128x128xf32>
    %61 = tpu.matmul %58, %60, %cst_39 {dimension_numbers = #tpu.dot_dimension_numbers<[1], [0], [0], [1], [0, 0, 1, 1], [], []>} : vector<128x4xbf16>, vector<4x128xbf16>, vector<128x128xf32> -> vector<128x128xf32>
    %62 = arith.addf %52, %61 : vector<128x128xf32>
    %c2_i32 = arith.constant 2 : i32
    %63 = arith.addi %1, %c2_i32 : i32
    %c0_40 = arith.constant 0 : index
    %64 = arith.index_cast %63 : i32 to index
    %c0_41 = arith.constant 0 : index
    %c0_42 = arith.constant 0 : index
    %65 = vector.load %arg3[%c0_40, %64, %c0_41, %c0_42] : memref<1x18x18x4xf32, #tpu.memory_space<vmem>>, vector<1x8x16x4xf32>
    %66 = vector.shape_cast %65 : vector<1x8x16x4xf32> to vector<8x16x4xf32>
    %67 = vector.shape_cast %66 : vector<8x16x4xf32> to vector<128x4xf32>
    %68 = arith.truncf %67 : vector<128x4xf32> to vector<128x4xbf16>
    %c6 = arith.constant 6 : index
    %c0_43 = arith.constant 0 : index
    %c0_44 = arith.constant 0 : index
    %69 = vector.load %arg4[%c6, %c0_43, %c0_44] : memref<9x4x128xbf16, #tpu.memory_space<vmem>>, vector<1x4x128xbf16>
    %70 = vector.shape_cast %69 : vector<1x4x128xbf16> to vector<4x128xbf16>
    %cst_45 = arith.constant dense<0.000000e+00> : vector<128x128xf32>
    %71 = tpu.matmul %68, %70, %cst_45 {dimension_numbers = #tpu.dot_dimension_numbers<[1], [0], [0], [1], [0, 0, 1, 1], [], []>} : vector<128x4xbf16>, vector<4x128xbf16>, vector<128x128xf32> -> vector<128x128xf32>
    %72 = arith.addf %62, %71 : vector<128x128xf32>
    %c2_i32_46 = arith.constant 2 : i32
    %73 = arith.addi %1, %c2_i32_46 : i32
    %c0_47 = arith.constant 0 : index
    %74 = arith.index_cast %73 : i32 to index
    %c1_48 = arith.constant 1 : index
    %c0_49 = arith.constant 0 : index
    %75 = vector.load %arg3[%c0_47, %74, %c1_48, %c0_49] : memref<1x18x18x4xf32, #tpu.memory_space<vmem>>, vector<1x8x16x4xf32>
    %76 = vector.shape_cast %75 : vector<1x8x16x4xf32> to vector<8x16x4xf32>
    %77 = vector.shape_cast %76 : vector<8x16x4xf32> to vector<128x4xf32>
    %78 = arith.truncf %77 : vector<128x4xf32> to vector<128x4xbf16>
    %c7 = arith.constant 7 : index
    %c0_50 = arith.constant 0 : index
    %c0_51 = arith.constant 0 : index
    %79 = vector.load %arg4[%c7, %c0_50, %c0_51] : memref<9x4x128xbf16, #tpu.memory_space<vmem>>, vector<1x4x128xbf16>
    %80 = vector.shape_cast %79 : vector<1x4x128xbf16> to vector<4x128xbf16>
    %cst_52 = arith.constant dense<0.000000e+00> : vector<128x128xf32>
    %81 = tpu.matmul %78, %80, %cst_52 {dimension_numbers = #tpu.dot_dimension_numbers<[1], [0], [0], [1], [0, 0, 1, 1], [], []>} : vector<128x4xbf16>, vector<4x128xbf16>, vector<128x128xf32> -> vector<128x128xf32>
    %82 = arith.addf %72, %81 : vector<128x128xf32>
    %c2_i32_53 = arith.constant 2 : i32
    %83 = arith.addi %1, %c2_i32_53 : i32
    %c0_54 = arith.constant 0 : index
    %84 = arith.index_cast %83 : i32 to index
    %c2_55 = arith.constant 2 : index
    %c0_56 = arith.constant 0 : index
    %85 = vector.load %arg3[%c0_54, %84, %c2_55, %c0_56] : memref<1x18x18x4xf32, #tpu.memory_space<vmem>>, vector<1x8x16x4xf32>
    %86 = vector.shape_cast %85 : vector<1x8x16x4xf32> to vector<8x16x4xf32>
    %87 = vector.shape_cast %86 : vector<8x16x4xf32> to vector<128x4xf32>
    %88 = arith.truncf %87 : vector<128x4xf32> to vector<128x4xbf16>
    %c8 = arith.constant 8 : index
    %c0_57 = arith.constant 0 : index
    %c0_58 = arith.constant 0 : index
    %89 = vector.load %arg4[%c8, %c0_57, %c0_58] : memref<9x4x128xbf16, #tpu.memory_space<vmem>>, vector<1x4x128xbf16>
    %90 = vector.shape_cast %89 : vector<1x4x128xbf16> to vector<4x128xbf16>
    %cst_59 = arith.constant dense<0.000000e+00> : vector<128x128xf32>
    %91 = tpu.matmul %88, %90, %cst_59 {dimension_numbers = #tpu.dot_dimension_numbers<[1], [0], [0], [1], [0, 0, 1, 1], [], []>} : vector<128x4xbf16>, vector<4x128xbf16>, vector<128x128xf32> -> vector<128x128xf32>
    %92 = arith.addf %82, %91 : vector<128x128xf32>
    %c0_60 = arith.constant 0 : index
    %c0_61 = arith.constant 0 : index
    %93 = vector.load %arg5[%c0_60, %c0_61] : memref<1x128xf32, #tpu.memory_space<vmem>>, vector<1x128xf32>
    %94 = vector.broadcast %93 : vector<1x128xf32> to vector<128x128xf32>
    %95 = arith.addf %92, %94 : vector<128x128xf32>
    %cst_62 = arith.constant 0.000000e+00 : f32
    %96 = vector.broadcast %cst_62 : f32 to vector<128x128xf32>
    %97 = arith.maximumf %95, %96 : vector<128x128xf32>
    %c0_63 = arith.constant 0 : index
    %c0_64 = arith.constant 0 : index
    %98 = vector.load %arg6[%c0_63, %c0_64] : memref<128x128xf32, #tpu.memory_space<vmem>>, vector<128x128xf32>
    tpu.vector_store %arg6[%c0_63, %c0_64], %97 {strides = array<i32>} : memref<128x128xf32, #tpu.memory_space<vmem>>, vector<128x128xf32>,
    return
  }
  func.func @transform_0(%arg0: i32, %arg1: i32, %arg2: i32) -> (i32, i32, i32, i32) {
    %c0_i32 = arith.constant 0 : i32
    %c0_i32_0 = arith.constant 0 : i32
    %c0_i32_1 = arith.constant 0 : i32
    %c0_i32_2 = arith.constant 0 : i32
    return %arg0, %c0_i32, %c0_i32_0, %c0_i32_1 : i32, i32, i32, i32
  }
  func.func @transform_1(%arg0: i32, %arg1: i32, %arg2: i32) -> (i32, i32, i32) {
    %c0_i32 = arith.constant 0 : i32
    %c0_i32_0 = arith.constant 0 : i32
    %c0_i32_1 = arith.constant 0 : i32
    return %c0_i32, %c0_i32_0, %arg2 : i32, i32, i32
  }
  func.func @transform_2(%arg0: i32, %arg1: i32, %arg2: i32) -> (i32, i32) {
    %c0_i32 = arith.constant 0 : i32
    %c0_i32_0 = arith.constant 0 : i32
    return %c0_i32, %arg2 : i32, i32
  }
  func.func @transform_3(%arg0: i32, %arg1: i32, %arg2: i32) -> (i32, i32) {
    %c2_i32 = arith.constant 2 : i32
    %0 = arith.muli %arg0, %c2_i32 : i32
    %1 = arith.addi %0, %arg1 : i32
    %c0_i32 = arith.constant 0 : i32
    return %1, %arg2 : i32, i32
  }
}

</mosaic_0001>

<bundles_post_ra>
// kernel: cbn_block.1
= control target key start
LH: loop header
LB: loop body
LE: loop exit
PB: predicated region body
PF: predicated region fallthrough
CT: control target
= control target key end

     0   :  { %s2446_s12 = smov 0   ;;  %s2448_s13 = smov 0   ;;  %s3015_s0 = inlined_call_operand.vmem [shape: f32[2,18,18,4], index: 0, kind: input, shape index: {}]   ;;  %s3016_s1 = inlined_call_operand.vmem [shape: bf16[9,4,128], index: 1, kind: input, shape index: {}]   ;;  %s3017_s2 = inlined_call_operand.vmem [shape: f32[1,128], index: 2, kind: input, shape index: {}]   ;;  %s3018_s3 = inlined_call_operand.vmem [shape: f32[512,128], index: 3, kind: output, shape index: {}]  }
   0x1   :  { %s2450_s14 = smov 0   ;;  %s2452_s15 = smov 0  }
   0x2   :  { %s2454_s16 = smov 0  }
   0x3 LB: > { %s28_s17 = sadd.s32 1, %s2416_s14  ;;  %s32_s18 = sadd.s32 1, %s2420_s15  ;;  %s2424_s16 = sphi %s2454_s16, %s13_s16   ;;  %s2420_s15 = sphi %s2452_s15, %s3058_s15   ;;  %s2416_s14 = sphi %s2450_s14, %s3057_s14   ;;  %s2412_s13 = sphi %s2448_s13, %s3056_s13   ;;  %s2408_s12 = sphi %s2446_s12, %s3055_s12  }
   0x4   : > { %p30_p0 = scmp.ge.s32.totalorder %s28_s17, 2  ;;  %p1900_p1 = scmp.ge.s32.totalorder %s2424_s16, 1 }
   0x5   : > { %p179_p2 = scmp.lt.s32.totalorder %s2424_s16, 5 }
   0x6   : > { %s3060_s17 = smov (%p30_p0, %s28_s17), 0  ;;  %s3062_s18 = smov (!%p30_p0, %s32_s18), %s2420_s15 }
   0x7   : > { %p180_p3 = pnand %p1900_p1, %p179_p2  ;;  %p34_p4 = scmp.ge.s32.totalorder %s3062_s18, 2 }
   0x9   : > { %s3064_s18 = smov (%p34_p4, %s3062_s18), 0  ;;  %183 = sbr.rel (%p180_p3) target bundleno = 372 (0x174), region = 32 }
   0xe   : > { %v1907_v0 = vld [vmem:[%s3016_s1 + $0x2] sm:$0x3]  ;;  %vm320_vm0 = vcmask 1041408   ;;  %p215_p5 = scmp.lt.s32.totalorder %s2412_s13, 1  ;;  %v268_v2 = vld [vmem:[%s3016_s1] sm:$0x3] }
   0xf   : > { %2336 = vmatprep.subr.msk.bf16.mxu1 %vm320_vm0, %v1907_v0  ;;  %2335 = vmatprep.subr.msk.bf16.mxu0 %vm320_vm0, %v1907_v0  ;;  %v322_v1 = vsel %vm320_vm0, %v1907_v0, 0  ;;  %v1924_v3 = vld [vmem:[%s3016_s1 + $0x4] sm:$0x3]  ;;  %s1906_s26 = smul.u32 192, %s2408_s12  ;;  %vm295_vm1 = vcmask 31744   ;;  %v446_v18 = vsel %vm320_vm0, %v268_v2, 0 }
  0x10   : > { %2334 = vmatpush3.bf16.msra.mxu1 %v322_v1  ;;  %2172 = vmatpush3.bf16.msra.mxu0 %v322_v1  ;;  %s216_s25 = scalar_select %p215_p5, %s2412_s13, 1  ;;  %v596_v15 = vsel %vm320_vm0, %v1924_v3, 0  ;;  %v1951_v24 = vld [vmem:[%s3016_s1 + $0x6] sm:$0x3]  ;;  %v1976_v25 = vld [vmem:[%s3016_s1 + $0x8] sm:$0x3] }
  0x11   : > { %2337 = vmatprep.subr.msk.bf16.mxu1 %vm320_vm0, %v268_v2  ;;  %2338 = vmatprep.subr.msk.bf16.mxu0 %vm320_vm0, %v1924_v3  ;;  %v931_v48 = vsel %vm320_vm0, %v1976_v25, 0  ;;  %v765_v50 = vsel %vm320_vm0, %v1951_v24, 0  ;;  %v2001_v52 = vld [vmem:[%s3016_s1 + $0xa] sm:$0x3]  ;;  %v2028_v53 = vld [vmem:[%s3016_s1 + $0xc] sm:$0x3] }
  0x12   : > { %s2345_s27 = smul.u32 432, %s216_s25  ;;  %s1902_s24 = sshll.u32 %s2412_s13, 1 }
  0x13   : > { %s228_s25 = sadd.s32 %s2408_s12, %s1902_s24 }
  0x14   : > { %s219_s30 = scalar_lea.vmem %s3015_s0, %s2345_s27 }
  0x15   : > { %s2500_s4 = scalar_lea.vmem %s219_s30, %s1906_s26  ;;  %s1903_s26 = sshll.u32 %s228_s25, 4 }
  0x16   : > { %v269_v4 = vld [vmem:[%s2500_s4 + $0x1] sm:$0xff]  ;;  %v270_v5 = vld [vmem:[%s2500_s4 + $0x9] sm:$0xff]  ;;  %v271_v9 = vld [vmem:[%s2500_s4 + $0x19] sm:$0xff]  ;;  %p230_p6 = scmp.lt.s32.totalorder %s1903_s26, 63 }
  0x17   : > { %v277_v6 = vld [vmem:[%s2500_s4 + $0x61] sm:$0xff]  ;;  %v285_v7 = vpack.c.bf16 %v270_v5, %v269_v4  ;;  %v278_v8 = vld [vmem:[%s2500_s4 + $0x69] sm:$0xff]  ;;  %v279_v13 = vld [vmem:[%s2500_s4 + $0x79] sm:$0xff] }
  0x18   : > { %v272_v10 = vld [vmem:[%s2500_s4 + $0x21] sm:$0xff]  ;;  %v2508_v11 = vpack.c.bf16 %v278_v8, %v277_v6  ;;  %v273_v16 = vld [vmem:[%s2500_s4 + $0x31] sm:$0xff]  ;;  %v274_v19 = vld [vmem:[%s2500_s4 + $0x39] sm:$0xff]  ;;  %s3066_s26 = smov (!%p230_p6, %s1903_s26), 63 }
  0x19   : > { %v2510_v12 = vpack.c.bf16 %v272_v10, %v271_v9  ;;  %v280_v14 = vld [vmem:[%s2500_s4 + $0x81] sm:$0xff]  ;;  %2173 = vmatprep.mubr.msk.bf16.mxu0 %vm295_vm1, %v285_v7  ;;  %v281_v20 = vld [vmem:[%s2500_s4 + $0x91] sm:$0xff]  ;;  %v282_v21 = vld [vmem:[%s2500_s4 + $0x99] sm:$0xff]  ;;  %v2527_v22 = vpack.c.bf16 %v274_v19, %v273_v16  ;;  %s1904_s27 = sshll.u32 %s3066_s26, 3 }
  0x1a   : > { %v2517_v17 = vpack.c.bf16 %v280_v14, %v279_v13  ;;  %2181 = vmatprep.mubr.msk.bf16.mxu1 %vm295_vm1, %v2508_v11  ;;  %v2529_v23 = vpack.c.bf16 %v282_v21, %v281_v20  ;;  %v275_v26 = vld [vmem:[%s2500_s4 + $0x49] sm:$0xff]  ;;  %v276_v27 = vld [vmem:[%s2500_s4 + $0x51] sm:$0xff]  ;;  %v244_v32 = vld [vmem:[%s2500_s4] sm:$0xff]  ;;  %s2927_s30 = scalar_lea.vmem %s3018_s3, %s1904_s27 }
  0x1b   : > { %2174 = vmatmul.mubr.msk.bf16.vlgmr.msra.gmra.mxu0 %vm295_vm1, %v2510_v12  ;;  %v283_v28 = vld [vmem:[%s2500_s4 + $0xa9] sm:$0xff]  ;;  %v284_v29 = vld [vmem:[%s2500_s4 + $0xb1] sm:$0xff]  ;;  %v2552_v34 = vpack.c.bf16 %v276_v27, %v275_v26  ;;  %v547_v38 = vld [vmem:[%s2500_s4 + $0x1a] sm:$0xff]  ;;  %v1097_v26 = vsel %vm320_vm0, %v2001_v52, 0 }
  0x1c   : > { %2182 = vmatmul.mubr.msk.bf16.vlgmr.msra.gmra.mxu1 %vm295_vm1, %v2517_v17  ;;  %2208 = vmatpush3.bf16.msra.mxu0 %v596_v15  ;;  %v545_v30 = vld [vmem:[%s2500_s4 + $0x2] sm:$0xff]  ;;  %v546_v31 = vld [vmem:[%s2500_s4 + $0xa] sm:$0xff]  ;;  %v2555_v35 = vpack.c.bf16 %v284_v29, %v283_v28  ;;  %v246_v40 = vld [vmem:[%s2500_s4 + $0x18] sm:$0xff] }
  0x1d   : > { %2190 = vmatpush3.bf16.msra.mxu1 %v446_v18  ;;  %2177 = vmatprep.mubr.msk.bf16.mxu0 %vm295_vm1, %v2527_v22  ;;  %v245_v33 = vld [vmem:[%s2500_s4 + $0x8] sm:$0xff]  ;;  %v561_v36 = vpack.c.bf16 %v546_v31, %v545_v30  ;;  %v247_v41 = vld [vmem:[%s2500_s4 + $0x20] sm:$0xff]  ;;  %v248_v42 = vld [vmem:[%s2500_s4 + $0x30] sm:$0xff] }
  0x1e   : > { %2185 = vmatprep.mubr.msk.bf16.mxu1 %vm295_vm1, %v2529_v23  ;;  %2339 = vmatprep.subr.msk.bf16.mxu1 %vm320_vm0, %v1951_v24  ;;  %v260_v37 = vpack.c.bf16 %v245_v33, %v244_v32  ;;  %v548_v39 = vld [vmem:[%s2500_s4 + $0x22] sm:$0xff]  ;;  %v249_v43 = vld [vmem:[%s2500_s4 + $0x38] sm:$0xff]  ;;  %v261_v47 = vpack.c.bf16 %v247_v41, %v246_v40  ;;  %v551_v55 = vld [vmem:[%s2500_s4 + $0x4a] sm:$0xff] }
  0x1f   : > { %2340 = vmatprep.subr.msk.bf16.mxu0 %vm320_vm0, %v1976_v25  ;;  %v2569_v44 = vpack.c.bf16 %v548_v39, %v547_v38  ;;  %v549_v45 = vld [vmem:[%s2500_s4 + $0x32] sm:$0xff]  ;;  %v550_v46 = vld [vmem:[%s2500_s4 + $0x3a] sm:$0xff]  ;;  %v2574_v49 = vpack.c.bf16 %v249_v43, %v248_v42  ;;  %v250_v54 = vld [vmem:[%s2500_s4 + $0x48] sm:$0xff]  ;;  %v1266_v25 = vsel %vm320_vm0, %v2028_v53, 0 }
  0x20   : > { %v2577_v51 = vpack.c.bf16 %v550_v46, %v549_v45  ;;  %v552_v56 = vld [vmem:[%s2500_s4 + $0x52] sm:$0xff]  ;;  %v553_v58 = vld [vmem:[%s2500_s4 + $0x62] sm:$0xff]  ;;  %v554_v59 = vld [vmem:[%s2500_s4 + $0x6a] sm:$0xff] }
  0x21   : > { %v251_v57 = vld [vmem:[%s2500_s4 + $0x50] sm:$0xff]  ;;  %v252_v60 = vld [vmem:[%s2500_s4 + $0x60] sm:$0xff]  ;;  %v253_v61 = vld [vmem:[%s2500_s4 + $0x68] sm:$0xff]  ;;  %v2601_v62 = vpack.c.bf16 %v552_v56, %v551_v55  ;;  %v2606_v0 = vpack.c.bf16 %v554_v59, %v553_v58 }
  0x22   : > { %v2604_v63 = vpack.c.bf16 %v251_v57, %v250_v54  ;;  %v2608_v1 = vpack.c.bf16 %v253_v61, %v252_v60  ;;  %v254_v2 = vld [vmem:[%s2500_s4 + $0x78] sm:$0xff]  ;;  %v556_v4 = vld [vmem:[%s2500_s4 + $0x82] sm:$0xff]  ;;  %v256_v8 = vld [vmem:[%s2500_s4 + $0x90] sm:$0xff] }
  0x23   : > { %2178 = vmatmul.mubr.msk.bf16.gmra.mxu0 %vm295_vm1, %v2552_v34  ;;  %v555_v3 = vld [vmem:[%s2500_s4 + $0x7a] sm:$0xff]  ;;  %v557_v6 = vld [vmem:[%s2500_s4 + $0x92] sm:$0xff]  ;;  %v559_v16 = vld [vmem:[%s2500_s4 + $0xaa] sm:$0xff] }
  0x24   : > { %2186 = vmatmul.mubr.msk.bf16.gmra.mxu1 %vm295_vm1, %v2555_v35  ;;  %2209 = vmatprep.mubr.msk.bf16.mxu0 %vm295_vm1, %v561_v36  ;;  %v255_v5 = vld [vmem:[%s2500_s4 + $0x80] sm:$0xff]  ;;  %v257_v9 = vld [vmem:[%s2500_s4 + $0x98] sm:$0xff]  ;;  %v2626_v10 = vpack.c.bf16 %v556_v4, %v555_v3  ;;  %v258_v19 = vld [vmem:[%s2500_s4 + $0xa8] sm:$0xff] }
  0x25   : > { %2191 = vmatprep.mubr.msk.bf16.mxu1 %vm295_vm1, %v260_v37  ;;  %v558_v7 = vld [vmem:[%s2500_s4 + $0x9a] sm:$0xff]  ;;  %v265_v13 = vpack.c.bf16 %v255_v5, %v254_v2  ;;  %v266_v15 = vpack.c.bf16 %v257_v9, %v256_v8  ;;  %v560_v18 = vld [vmem:[%s2500_s4 + $0xb2] sm:$0xff]  ;;  %v2053_v27 = vld [vmem:[%s3016_s1 + $0xe] sm:$0x3] }
  0x26   : > { %v2628_v14 = vpack.c.bf16 %v558_v7, %v557_v6  ;;  %v259_v20 = vld [vmem:[%s2500_s4 + $0xb0] sm:$0xff]  ;;  %v2640_v21 = vpack.c.bf16 %v560_v18, %v559_v16  ;;  %v1974_v28 = vld [vmem:[%s2500_s4 + $0xc1] sm:$0xff]  ;;  %v1432_v37 = vsel %vm320_vm0, %v2053_v27, 0  ;;  %v2026_v38 = vld [vmem:[%s2500_s4 + $0xd8] sm:$0xff] }
  0x27   : > { %v267_v24 = vpack.c.bf16 %v259_v20, %v258_v19  ;;  %v1975_v29 = vld [vmem:[%s2500_s4 + $0xc9] sm:$0xff]  ;;  %v1949_v30 = vld [vmem:[%s2500_s4 + $0xc0] sm:$0xff] }
  0x28   : > { %v1950_v31 = vld [vmem:[%s2500_s4 + $0xc8] sm:$0xff]  ;;  %v903_v32 = vpack.c.bf16 %v1975_v29, %v1974_v28  ;;  %v2027_v39 = vld [vmem:[%s2500_s4 + $0xe0] sm:$0xff] }
  0x29   : > { %v737_v33 = vpack.c.bf16 %v1950_v31, %v1949_v30  ;;  %v1999_v40 = vld [vmem:[%s2500_s4 + $0xc2] sm:$0xff]  ;;  %v2000_v41 = vld [vmem:[%s2500_s4 + $0xca] sm:$0xff]  ;;  %v1238_v42 = vpack.c.bf16 %v2027_v39, %v2026_v38 }
  0x2a   : > { %v1069_v43 = vpack.c.bf16 %v2000_v41, %v1999_v40 }
  0x2b   : > { %2210 = vmatmul.mubr.msk.bf16.vlgmr.msra.gmra.mxu0 %vm295_vm1, %v2569_v44 }
  0x2c   : > { %2192 = vmatmul.mubr.msk.bf16.vlgmr.msra.gmra.mxu1 %vm295_vm1, %v261_v47  ;;  %2244 = vmatpush3.bf16.msra.mxu0 %v931_v48 }
  0x2d   : > { %2226 = vmatpush3.bf16.msra.mxu1 %v765_v50  ;;  %2195 = vmatprep.mubr.msk.bf16.mxu1 %vm295_vm1, %v2574_v49 }
  0x2e   : > { %2213 = vmatprep.mubr.msk.bf16.mxu0 %vm295_vm1, %v2577_v51  ;;  %2341 = vmatprep.subr.msk.bf16.mxu1 %vm320_vm0, %v2001_v52 }
  0x2f   : > { %2342 = vmatprep.subr.msk.bf16.mxu0 %vm320_vm0, %v2028_v53 }
  0x33   : > { %2214 = vmatmul.mubr.msk.bf16.gmra.mxu0 %vm295_vm1, %v2601_v62 }
  0x34   : > { %2196 = vmatmul.mubr.msk.bf16.gmra.mxu1 %vm295_vm1, %v2604_v63  ;;  %2217 = vmatprep.mubr.msk.bf16.mxu0 %vm295_vm1, %v2606_v0 }
  0x35   : > { %2199 = vmatprep.mubr.msk.bf16.mxu1 %vm295_vm1, %v2608_v1 }
  0x3b   : > { %2218 = vmatmul.mubr.msk.bf16.gmra.mxu0 %vm295_vm1, %v2626_v10 }
  0x3c   : > { %2200 = vmatmul.mubr.msk.bf16.gmra.mxu1 %vm295_vm1, %v265_v13  ;;  %2221 = vmatprep.mubr.msk.bf16.mxu0 %vm295_vm1, %v2628_v14 }
  0x3d   : > { %2203 = vmatprep.mubr.msk.bf16.mxu1 %vm295_vm1, %v266_v15 }
  0x43   : > { %2222 = vmatmul.mubr.msk.bf16.gmra.mxu0 %vm295_vm1, %v2640_v21 }
  0x44   : > { %2204 = vmatmul.mubr.msk.bf16.gmra.mxu1 %vm295_vm1, %v267_v24  ;;  %2245 = vmatprep.mubr.msk.bf16.mxu0 %vm295_vm1, %v2510_v12  ;;  %v2078_v12 = vld [vmem:[%s3016_s1 + $0x10] sm:$0x3] }
  0x45   : > { %2227 = vmatprep.mubr.msk.bf16.mxu1 %vm295_vm1, %v261_v47  ;;  %v1598_v36 = vsel %vm320_vm0, %v2078_v12, 0 }
  0x4b   : > { %2246 = vmatmul.mubr.msk.bf16.vlgmr.msra.gmra.mxu0 %vm295_vm1, %v2527_v22 }
  0x4c   : > { %2228 = vmatmul.mubr.msk.bf16.vlgmr.msra.gmra.mxu1 %vm295_vm1, %v2574_v49  ;;  %2280 = vmatpush3.bf16.msra.mxu0 %v1266_v25 }
  0x4d   : > { %2262 = vmatpush3.bf16.msra.mxu1 %v1097_v26  ;;  %2231 = vmatprep.mubr.msk.bf16.mxu1 %vm295_vm1, %v2604_v63 }
  0x4e   : > { %2249 = vmatprep.mubr.msk.bf16.mxu0 %vm295_vm1, %v2552_v34  ;;  %2343 = vmatprep.subr.msk.bf16.mxu1 %vm320_vm0, %v2053_v27 }
  0x4f   : > { %2344 = vmatprep.subr.msk.bf16.mxu0 %vm320_vm0, %v2078_v12 }
  0x53   : > { %2250 = vmatmul.mubr.msk.bf16.gmra.mxu0 %vm295_vm1, %v2508_v11 }
  0x54   : > { %2232 = vmatmul.mubr.msk.bf16.gmra.mxu1 %vm295_vm1, %v2608_v1  ;;  %2253 = vmatprep.mubr.msk.bf16.mxu0 %vm295_vm1, %v2517_v17 }
  0x55   : > { %2235 = vmatprep.mubr.msk.bf16.mxu1 %vm295_vm1, %v265_v13 }
  0x5b   : > { %2254 = vmatmul.mubr.msk.bf16.gmra.mxu0 %vm295_vm1, %v2529_v23 }
  0x5c   : > { %2236 = vmatmul.mubr.msk.bf16.gmra.mxu1 %vm295_vm1, %v266_v15  ;;  %2257 = vmatprep.mubr.msk.bf16.mxu0 %vm295_vm1, %v2555_v35 }
  0x5d   : > { %2239 = vmatprep.mubr.msk.bf16.mxu1 %vm295_vm1, %v267_v24 }
  0x63   : > { %2258 = vmatmul.mubr.msk.bf16.gmra.mxu0 %vm295_vm1, %v903_v32 }
  0x64   : > { %2240 = vmatmul.mubr.msk.bf16.gmra.mxu1 %vm295_vm1, %v737_v33  ;;  %2281 = vmatprep.mubr.msk.bf16.mxu0 %vm295_vm1, %v2574_v49 }
  0x65   : > { %2263 = vmatprep.mubr.msk.bf16.mxu1 %vm295_vm1, %v2569_v44 }
  0x6b   : > { %2282 = vmatmul.mubr.msk.bf16.vlgmr.msra.gmra.mxu0 %vm295_vm1, %v2604_v63 }
  0x6c   : > { %2264 = vmatmul.mubr.msk.bf16.vlgmr.msra.gmra.mxu1 %vm295_vm1, %v2577_v51  ;;  %2316 = vmatpush3.bf16.msra.mxu0 %v1598_v36 }
  0x6d   : > { %2298 = vmatpush3.bf16.msra.mxu1 %v1432_v37  ;;  %2267 = vmatprep.mubr.msk.bf16.mxu1 %vm295_vm1, %v2601_v62 }
  0x6e   : > { %2285 = vmatprep.mubr.msk.bf16.mxu0 %vm295_vm1, %v2608_v1 }
  0x73   : > { %2286 = vmatmul.mubr.msk.bf16.gmra.mxu0 %vm295_vm1, %v265_v13 }
  0x74   : > { %2268 = vmatmul.mubr.msk.bf16.gmra.mxu1 %vm295_vm1, %v2606_v0  ;;  %2289 = vmatprep.mubr.msk.bf16.mxu0 %vm295_vm1, %v266_v15 }
  0x75   : > { %2271 = vmatprep.mubr.msk.bf16.mxu1 %vm295_vm1, %v2626_v10 }
  0x7b   : > { %2290 = vmatmul.mubr.msk.bf16.gmra.mxu0 %vm295_vm1, %v267_v24 }
  0x7c   : > { %2272 = vmatmul.mubr.msk.bf16.gmra.mxu1 %vm295_vm1, %v2628_v14  ;;  %2293 = vmatprep.mubr.msk.bf16.mxu0 %vm295_vm1, %v737_v33 }
  0x7d   : > { %2275 = vmatprep.mubr.msk.bf16.mxu1 %vm295_vm1, %v2640_v21 }
  0x83   : > { %2294 = vmatmul.mubr.msk.bf16.gmra.mxu0 %vm295_vm1, %v1238_v42 }
  0x84   : > { %2276 = vmatmul.mubr.msk.bf16.gmra.mxu1 %vm295_vm1, %v1069_v43  ;;  %2317 = vmatprep.mubr.msk.bf16.mxu0 %vm295_vm1, %v2577_v51 }
  0x85   : > { %2299 = vmatprep.mubr.msk.bf16.mxu1 %vm295_vm1, %v2527_v22  ;;  %v2077_v22 = vld [vmem:[%s2500_s4 + $0xe2] sm:$0xff] }
  0x8b   : > { %2318 = vmatmul.mubr.msk.bf16.vlgmr.msra.gmra.mxu0 %vm295_vm1, %v2601_v62 }
  0x8c   : > { %2300 = vmatmul.mubr.msk.bf16.vlgmr.msra.gmra.mxu1 %vm295_vm1, %v2552_v34  ;;  %2321 = vmatprep.mubr.msk.bf16.mxu0 %vm295_vm1, %v2606_v0  ;;  %v2051_v34 = vld [vmem:[%s2500_s4 + $0xd9] sm:$0xff] }
  0x8d   : > { %2303 = vmatprep.mubr.msk.bf16.mxu1 %vm295_vm1, %v2508_v11  ;;  %v2076_v11 = vld [vmem:[%s2500_s4 + $0xda] sm:$0xff] }
  0x8e   : > { %v1570_v44 = vpack.c.bf16 %v2077_v22, %v2076_v11 }
  0x93   : > { %2322 = vmatmul.mubr.msk.bf16.gmra.mxu0 %vm295_vm1, %v2626_v10 }
  0x94   : > { %2304 = vmatmul.mubr.msk.bf16.gmra.mxu1 %vm295_vm1, %v2517_v17  ;;  %2325 = vmatprep.mubr.msk.bf16.mxu0 %vm295_vm1, %v2628_v14  ;;  %v2052_v17 = vld [vmem:[%s2500_s4 + $0xe1] sm:$0xff] }
  0x95   : > { %2307 = vmatprep.mubr.msk.bf16.mxu1 %vm295_vm1, %v2529_v23  ;;  %v1404_v45 = vpack.c.bf16 %v2052_v17, %v2051_v34 }
  0x9b   : > { %2326 = vmatmul.mubr.msk.bf16.gmra.mxu0 %vm295_vm1, %v2640_v21 }
  0x9c   : > { %2308 = vmatmul.mubr.msk.bf16.gmra.mxu1 %vm295_vm1, %v2555_v35  ;;  %2329 = vmatprep.mubr.msk.bf16.mxu0 %vm295_vm1, %v1069_v43 }
  0x9d   : > { %2311 = vmatprep.mubr.msk.bf16.mxu1 %vm295_vm1, %v903_v32 }
  0xa3   : > { %2330 = vmatmul.mubr.msk.bf16.gmra.mxu0 %vm295_vm1, %v1570_v44 }
  0xa4   : > { %2312 = vmatmul.mubr.msk.bf16.gmra.mxu1 %vm295_vm1, %v1404_v45 }
  0xdb   : > { %v2175_v23 = vpop.f32.mrf.mxu0 }
  0xdc   : > { %v2183_v46 = vpop.f32.mrf.mxu1 }
  0xdd   : > { %v358_v47 = vpop.f32.mrf.mxu0 }
  0xde   : > { %v390_v48 = vpop.f32.mrf.mxu1 }
  0xdf   : > { %v2176_v49 = vpop.f32.mrf.mxu0 }
  0xe0   : > { %v2184_v35 = vpop.f32.mrf.mxu1 }
  0xe1   : > { %v361_v50 = vpop.f32.mrf.mxu0 }
  0xe2   : > { %v393_v51 = vpop.f32.mrf.mxu1 }
  0xe3   : > { %v2179_v52 = vpop.f32.mrf.mxu0 }
  0xe4   : > { %v2187_v53 = vpop.f32.mrf.mxu1 }
  0xe5   : > { %v374_v54 = vpop.f32.mrf.mxu0 }
  0xe6   : > { %v406_v55 = vpop.f32.mrf.mxu1 }
  0xe7   : > { %v2180_v56 = vpop.f32.mrf.mxu0 }
  0xe8   : > { %v2188_v57 = vpop.f32.mrf.mxu1 }
  0xe9   : > { %v377_v58 = vpop.f32.mrf.mxu0 }
  0xea   : > { %v2749_v59 = vpop.f32.mrf.mxu1 }
  0xeb   : > { %v2211_v60 = vpop.f32.mrf.mxu0 }
  0xec   : > { %v2193_v61 = vpop.f32.mrf.mxu1 }
  0xed   : > { %v491_v62 = vadd.f32 %v2193_v61, %v2175_v23  ;;  %v632_v63 = vpop.f32.mrf.mxu0 }
  0xee   : > { %v482_v0 = vpop.f32.mrf.mxu1 }
  0xef   : > { %v2751_v1 = vadd.f32 %v2211_v60, %v491_v62  ;;  %v483_v2 = vadd.f32 %v482_v0, %v358_v47  ;;  %v2212_v3 = vpop.f32.mrf.mxu0 }
  0xf0   : > { %v2194_v4 = vpop.f32.mrf.mxu1 }
  0xf1   : > { %v2753_v5 = vadd.f32 %v632_v63, %v483_v2  ;;  %v494_v6 = vadd.f32 %v2194_v4, %v2176_v49  ;;  %v635_v7 = vpop.f32.mrf.mxu0 }
  0xf2   : > { %v485_v8 = vpop.f32.mrf.mxu1 }
  0xf3   : > { %v2755_v9 = vadd.f32 %v2212_v3, %v494_v6  ;;  %v486_v10 = vadd.f32 %v485_v8, %v361_v50  ;;  %v2215_v13 = vpop.f32.mrf.mxu0 }
  0xf4   : > { %v2197_v14 = vpop.f32.mrf.mxu1 }
  0xf5   : > { %v2757_v15 = vadd.f32 %v635_v7, %v486_v10  ;;  %v507_v16 = vadd.f32 %v2197_v14, %v2179_v52  ;;  %v648_v18 = vpop.f32.mrf.mxu0 }
  0xf6   : > { %v498_v19 = vpop.f32.mrf.mxu1 }
  0xf7   : > { %v2759_v20 = vadd.f32 %v2215_v13, %v507_v16  ;;  %v499_v21 = vadd.f32 %v498_v19, %v374_v54  ;;  %v2216_v24 = vpop.f32.mrf.mxu0 }
  0xf8   : > { %v2198_v25 = vpop.f32.mrf.mxu1 }
  0xf9   : > { %v2761_v26 = vadd.f32 %v648_v18, %v499_v21  ;;  %v510_v27 = vadd.f32 %v2198_v25, %v2180_v56  ;;  %v651_v12 = vpop.f32.mrf.mxu0 }
  0xfa   : > { %v501_v28 = vpop.f32.mrf.mxu1 }
  0xfb   : > { %v2763_v29 = vadd.f32 %v2216_v24, %v510_v27  ;;  %v502_v30 = vadd.f32 %v501_v28, %v377_v58  ;;  %v2219_v31 = vpop.f32.mrf.mxu0 }
  0xfc   : > { %v2201_v32 = vpop.f32.mrf.mxu1 }
  0xfd   : > { %v2765_v33 = vadd.f32 %v651_v12, %v502_v30  ;;  %v523_v36 = vadd.f32 %v2201_v32, %v2183_v46  ;;  %v664_v37 = vpop.f32.mrf.mxu0 }
  0xfe   : > { %v514_v38 = vpop.f32.mrf.mxu1 }
  0xff   : > { %v2767_v39 = vadd.f32 %v2219_v31, %v523_v36  ;;  %v515_v40 = vadd.f32 %v514_v38, %v390_v48  ;;  %v2220_v41 = vpop.f32.mrf.mxu0 }
 0x100   : > { %v2202_v42 = vpop.f32.mrf.mxu1 }
 0x101   : > { %v2769_v43 = vadd.f32 %v664_v37, %v515_v40  ;;  %v526_v11 = vadd.f32 %v2202_v42, %v2184_v35  ;;  %v667_v22 = vpop.f32.mrf.mxu0 }
 0x102   : > { %v517_v34 = vpop.f32.mrf.mxu1 }
 0x103   : > { %v2771_v17 = vadd.f32 %v2220_v41, %v526_v11  ;;  %v518_v44 = vadd.f32 %v517_v34, %v393_v51  ;;  %v2223_v45 = vpop.f32.mrf.mxu0 }
 0x104   : > { %v2205_v23 = vpop.f32.mrf.mxu1 }
 0x105   : > { %v2773_v47 = vadd.f32 %v667_v22, %v518_v44  ;;  %v539_v46 = vadd.f32 %v2205_v23, %v2187_v53  ;;  %v680_v49 = vpop.f32.mrf.mxu0 }
 0x106   : > { %v530_v50 = vpop.f32.mrf.mxu1 }
 0x107   : > { %v2775_v52 = vadd.f32 %v2223_v45, %v539_v46  ;;  %v531_v48 = vadd.f32 %v530_v50, %v406_v55  ;;  %v2224_v54 = vpop.f32.mrf.mxu0 }
 0x108   : > { %v2206_v56 = vpop.f32.mrf.mxu1 }
 0x109   : > { %v2777_v58 = vadd.f32 %v680_v49, %v531_v48  ;;  %v542_v35 = vadd.f32 %v2206_v56, %v2188_v57  ;;  %v683_v60 = vpop.f32.mrf.mxu0 }
 0x10a   : > { %v533_v61 = vpop.f32.mrf.mxu1 }
 0x10b   : > { %3019 = vst [vmem:[#allocation2_spill] sm:$0xff] %v2777_v58  ;;  %v2779_v62 = vadd.f32 %v2224_v54, %v542_v35  ;;  %v534_v51 = vadd.f32 %v533_v61, %v2749_v59  ;;  %v2782_v63 = vpop.f32.mrf.mxu0 }
 0x10c   : > { %v2229_v0 = vpop.f32.mrf.mxu1 }
 0x10d   : > { %3020 = vst [vmem:[#allocation3_spill] sm:$0xff] %v2779_v62  ;;  %v2784_v53 = vadd.f32 %v683_v60, %v534_v51  ;;  %v2786_v2 = vpop.f32.mrf.mxu0  ;;  %v866_v62 = vadd.f32 %v2229_v0, %v2751_v1 }
 0x10e   : > { %v801_v3 = vpop.f32.mrf.mxu1 }
 0x10f   : > { %3021 = vst [vmem:[#allocation4_spill] sm:$0xff] %v2784_v53  ;;  %v2788_v55 = vpop.f32.mrf.mxu0 }
 0x110   : > { %v2230_v4 = vpop.f32.mrf.mxu1 }
 0x111   : > { %v2790_v6 = vpop.f32.mrf.mxu0 }
 0x112   : > { %v804_v57 = vpop.f32.mrf.mxu1 }
 0x113   : > { %v2792_v7 = vpop.f32.mrf.mxu0  ;;  %v865_v0 = vadd.f32 %v804_v57, %v2757_v15 }
 0x114   : > { %v2794_v8 = vpop.f32.mrf.mxu1 }
 0x115   : > { %v2796_v10 = vpop.f32.mrf.mxu0  ;;  %v1031_v15 = vadd.f32 %v2790_v6, %v865_v0 }
 0x116   : > { %v2798_v59 = vpop.f32.mrf.mxu1 }
 0x117   : > { %v2800_v13 = vpop.f32.mrf.mxu0 }
 0x118   : > { %v2802_v14 = vpop.f32.mrf.mxu1 }
 0x119   : > { %v2804_v16 = vpop.f32.mrf.mxu0 }
 0x11a   : > { %v2806_v18 = vpop.f32.mrf.mxu1 }
 0x11b   : > { %v2808_v19 = vpop.f32.mrf.mxu0  ;;  %v869_v6 = vadd.f32 %v2806_v18, %v2765_v33 }
 0x11c   : > { %v2810_v21 = vpop.f32.mrf.mxu1 }
 0x11d   : > { %v2812_v24 = vpop.f32.mrf.mxu0 }
 0x11e   : > { %v2814_v25 = vpop.f32.mrf.mxu1 }
 0x11f   : > { %v2816_v27 = vpop.f32.mrf.mxu0 }
 0x120   : > { %v2818_v12 = vpop.f32.mrf.mxu1 }
 0x121   : > { %v2820_v28 = vpop.f32.mrf.mxu0 }
 0x122   : > { %3022 = vst [vmem:[#allocation5_spill] sm:$0xff] %v2820_v28  ;;  %v2822_v30 = vpop.f32.mrf.mxu1 }
 0x123   : > { %v2824_v31 = vpop.f32.mrf.mxu0 }
 0x124   : > { %3023 = vst [vmem:[#allocation6_spill] sm:$0xff] %v2824_v31  ;;  %v2826_v32 = vpop.f32.mrf.mxu1 }
 0x125   : > { %v2828_v36 = vpop.f32.mrf.mxu0 }
 0x126   : > { %3024 = vst [vmem:[#allocation7_spill] sm:$0xff] %v2828_v36  ;;  %v2830_v37 = vpop.f32.mrf.mxu1 }
 0x127   : > { %3025 = vst [vmem:[#allocation8_spill] sm:$0xff] %v2830_v37  ;;  %v2832_v38 = vpop.f32.mrf.mxu0 }
 0x128   : > { %3026 = vst [vmem:[#allocation9_spill] sm:$0xff] %v2832_v38  ;;  %v2834_v40 = vpop.f32.mrf.mxu1 }
 0x129   : > { %3027 = vst [vmem:[#allocation10_spill] sm:$0xff] %v2834_v40  ;;  %v2836_v41 = vpop.f32.mrf.mxu0 }
 0x12a   : > { %3028 = vst [vmem:[#allocation11_spill] sm:$0xff] %v2836_v41  ;;  %v2838_v42 = vpop.f32.mrf.mxu1 }
 0x12b   : > { %3029 = vst [vmem:[#allocation12_spill] sm:$0xff] %v2838_v42  ;;  %v2283_v11 = vpop.f32.mrf.mxu0 }
 0x12c   : > { %v2265_v22 = vpop.f32.mrf.mxu1 }
 0x12d   : > { %v1302_v34 = vpop.f32.mrf.mxu0 }
 0x12e   : > { %v1133_v44 = vpop.f32.mrf.mxu1 }
 0x12f   : > { %v2284_v45 = vpop.f32.mrf.mxu0 }
 0x130   : > { %v2266_v23 = vpop.f32.mrf.mxu1 }
 0x131   : > { %v2840_v46 = vpop.f32.mrf.mxu0 }
 0x132   : > { %v1136_v49 = vpop.f32.mrf.mxu1 }
 0x133   : > { %v2842_v50 = vpop.f32.mrf.mxu0 }
 0x134   : > { %v2269_v48 = vpop.f32.mrf.mxu1 }
 0x135   : > { %v2844_v54 = vpop.f32.mrf.mxu0 }
 0x136   : > { %v1149_v56 = vpop.f32.mrf.mxu1 }
 0x137   : > { %v2846_v35 = vpop.f32.mrf.mxu0 }
 0x138   : > { %v2848_v60 = vpop.f32.mrf.mxu1 }
 0x139   : > { %v2850_v61 = vpop.f32.mrf.mxu0 }
 0x13a   : > { %v2852_v51 = vpop.f32.mrf.mxu1 }
 0x13b   : > { %v2854_v41 = vpop.f32.mrf.mxu0 }
 0x13c   : > { %3030 = vst [vmem:[#allocation13_spill] sm:$0xff] %v2854_v41  ;;  %v2856_v38 = vpop.f32.mrf.mxu1  ;;  %v864_v41 = vadd.f32 %v801_v3, %v2753_v5  ;;  %v870_v5 = vadd.f32 %v2794_v8, %v2759_v20 }
 0x13d   : > { %v2858_v42 = vpop.f32.mrf.mxu0 }
 0x13e   : > { %3031 = vst [vmem:[#allocation14_spill] sm:$0xff] %v2858_v42  ;;  %v2860_v53 = vpop.f32.mrf.mxu1  ;;  %v1032_v42 = vadd.f32 %v2782_v63, %v866_v62  ;;  %v1030_v1 = vadd.f32 %v2786_v2, %v864_v41  ;;  %v1036_v8 = vadd.f32 %v2792_v7, %v870_v5 }
 0x13f   : > { %3032 = vst [vmem:[#allocation15_spill] sm:$0xff] %v2860_v53  ;;  %v2863_v36 = vpop.f32.mrf.mxu0 }
 0x140   : > { %3033 = vst [vmem:[#allocation16_spill] sm:$0xff] %v2863_v36  ;;  %v2865_v40 = vpop.f32.mrf.mxu1  ;;  %v867_v36 = vadd.f32 %v2230_v4, %v2755_v9  ;;  %v1196_v9 = vadd.f32 %v1133_v44, %v1030_v1  ;;  %v868_v4 = vadd.f32 %v2798_v59, %v2761_v26 }
 0x141   : > { %3034 = vst [vmem:[#allocation17_spill] sm:$0xff] %v2865_v40  ;;  %v2868_v31 = vpop.f32.mrf.mxu0 }
 0x142   : > { %3035 = vst [vmem:[#allocation18_spill] sm:$0xff] %v2868_v31  ;;  %v2871_v37 = vpop.f32.mrf.mxu1  ;;  %v1198_v31 = vadd.f32 %v2265_v22, %v1032_v42  ;;  %v1033_v62 = vadd.f32 %v2788_v55, %v867_v36  ;;  %v871_v55 = vadd.f32 %v2802_v14, %v2763_v29  ;;  %v1365_v42 = vadd.f32 %v1302_v34, %v1196_v9 }
 0x143   : > { %3036 = vst [vmem:[#allocation19_spill] sm:$0xff] %v2871_v37  ;;  %v2874_v58 = vpop.f32.mrf.mxu0  ;;  %v1197_v22 = vadd.f32 %v1136_v49, %v1031_v15  ;;  %v1034_v59 = vadd.f32 %v2796_v10, %v868_v4  ;;  %v874_v10 = vadd.f32 %v2810_v21, %v2767_v39  ;;  %v872_v9 = vadd.f32 %v2814_v25, %v2769_v43 }
 0x144   : > { %v2876_v28 = vpop.f32.mrf.mxu1  ;;  %v1367_v57 = vadd.f32 %v2283_v11, %v1198_v31  ;;  %v1199_v41 = vadd.f32 %v2266_v23, %v1033_v62  ;;  %v1202_v31 = vadd.f32 %v2269_v48, %v1036_v8  ;;  %v2911_v11 = vld [vmem:[%s3017_s2] ss:$0 sm:$0xff]  ;;  %v1037_v49 = vadd.f32 %v2800_v13, %v871_v55 }
 0x145   : > { %v2880_v53 = vpop.f32.mrf.mxu0  ;;  %v1200_v1 = vadd.f32 %v1149_v56, %v1034_v59  ;;  %v1366_v33 = vadd.f32 %v2840_v46, %v1197_v22  ;;  %v875_v43 = vadd.f32 %v2818_v12, %v2771_v17 }
 0x146   : > { %v2882_v40 = vpop.f32.mrf.mxu1  ;;  %v1368_v23 = vadd.f32 %v2284_v45, %v1199_v41  ;;  %v1035_v45 = vadd.f32 %v2804_v16, %v869_v6  ;;  %v1371_v4 = vadd.f32 %v2842_v50, %v1202_v31  ;;  %v1203_v13 = vadd.f32 %v2848_v60, %v1037_v49 }
 0x147   : > { %v2886_v37 = vpop.f32.mrf.mxu0  ;;  %v1369_v25 = vadd.f32 %v2844_v54, %v1200_v1  ;;  %v1041_v6 = vadd.f32 %v2816_v27, %v875_v43  ;;  %v3040_v27 = vld [vmem:[#allocation8_spill] sm:$0xff] }
 0x148   : > { %v2890_v3 = vpop.f32.mrf.mxu1  ;;  %v1201_v50 = vadd.f32 %v2852_v51, %v1035_v45  ;;  %v1372_v17 = vadd.f32 %v2846_v35, %v1203_v13  ;;  %v3044_v13 = vld [vmem:[#allocation3_spill] sm:$0xff] }
 0x149   : > { %v2893_v63 = vpop.f32.mrf.mxu0 }
 0x14a   : > { %v2897_v2 = vpop.f32.mrf.mxu1 }
 0x14b   : > { %v2319_v20 = vpop.f32.mrf.mxu0 }
 0x14c   : > { %v2301_v36 = vpop.f32.mrf.mxu1 }
 0x14d   : > { %v1533_v44 = vadd.f32 %v2301_v36, %v1367_v57  ;;  %v1634_v26 = vpop.f32.mrf.mxu0  ;;  %v1040_v57 = vadd.f32 %v2808_v19, %v874_v10  ;;  %v873_v19 = vadd.f32 %v2822_v30, %v2773_v47  ;;  %v1370_v47 = vadd.f32 %v2850_v61, %v1201_v50  ;;  %v3037_v30 = vld [vmem:[#allocation15_spill] sm:$0xff]  ;;  %v3039_v10 = vld [vmem:[#allocation2_spill] sm:$0xff] }
 0x14e   : > { %v1468_v7 = vpop.f32.mrf.mxu1  ;;  %v876_v1 = vadd.f32 %v3040_v27, %v3039_v10 }
 0x14f   : > { %v1699_v29 = vadd.f32 %v2319_v20, %v1533_v44  ;;  %v1531_v14 = vadd.f32 %v1468_v7, %v1365_v42  ;;  %v2320_v34 = vpop.f32.mrf.mxu0  ;;  %v1038_v42 = vadd.f32 %v2812_v24, %v872_v9  ;;  %v1206_v12 = vadd.f32 %v2856_v38, %v1040_v57  ;;  %v3043_v9 = vld [vmem:[#allocation6_spill] sm:$0xff] }
 0x150   : > { %v2302_v0 = vpop.f32.mrf.mxu1  ;;  %v878_v24 = vadd.f32 %v2826_v32, %v2775_v52  ;;  %v3042_v32 = vld [vmem:[#allocation17_spill] sm:$0xff] }
 0x151   : > { %v1722_v18 = vadd.f32 %v2911_v11, %v1699_v29  ;;  %v1697_v48 = vadd.f32 %v1634_v26, %v1531_v14  ;;  %v1534_v5 = vadd.f32 %v2302_v0, %v1368_v23  ;;  %v1637_v62 = vpop.f32.mrf.mxu0  ;;  %v1204_v35 = vadd.f32 %v3037_v30, %v1038_v42  ;;  %v3041_v0 = vld [vmem:[#allocation13_spill] sm:$0xff] }
 0x152   : > { %v1471_v39 = vpop.f32.mrf.mxu1  ;;  %v1375_v52 = vadd.f32 %v3041_v0, %v1206_v12  ;;  %v1207_v61 = vadd.f32 %v3042_v32, %v1041_v6  ;;  %v3052_v6 = vld [vmem:[#allocation9_spill] sm:$0xff] }
 0x153   : > { %v1738_v21 = vmax.f32 %v1722_v18, 0.0  ;;  %v1720_v46 = vadd.f32 %v2911_v11, %v1697_v48  ;;  %v1700_v56 = vadd.f32 %v2320_v34, %v1534_v5  ;;  %v1532_v15 = vadd.f32 %v1471_v39, %v1366_v33  ;;  %v2323_v16 = vpop.f32.mrf.mxu0  ;;  %v3038_v34 = vld [vmem:[#allocation5_spill] sm:$0xff]  ;;  %v3045_v39 = vld [vmem:[#allocation10_spill] sm:$0xff] }
 0x154   : > { %v2305_v60 = vpop.f32.mrf.mxu1  ;;  %v1039_v49 = vadd.f32 %v3038_v34, %v873_v19  ;;  %v3051_v19 = vld [vmem:[#allocation16_spill] sm:$0xff] }
 0x155   : > { %1754 = vst [vmem:[%s2927_s30 + $0x10] sm:$0xff] %v1738_v21  ;;  %v1736_v41 = vmax.f32 %v1720_v46, 0.0  ;;  %v1723_v20 = vadd.f32 %v2911_v11, %v1700_v56  ;;  %v1698_v8 = vadd.f32 %v1637_v62, %v1532_v15  ;;  %v1537_v55 = vadd.f32 %v2305_v60, %v1371_v4  ;;  %v1650_v36 = vpop.f32.mrf.mxu0  ;;  %v3046_v46 = vld [vmem:[#allocation14_spill] sm:$0xff]  ;;  %v3047_v15 = vld [vmem:[#allocation19_spill] sm:$0xff] }
 0x156   : > { %v1484_v54 = vpop.f32.mrf.mxu1  ;;  %v1044_v4 = vadd.f32 %v3043_v9, %v878_v24  ;;  %v879_v21 = vadd.f32 %v3045_v39, %v3044_v13  ;;  %v1373_v56 = vadd.f32 %v3046_v46, %v1204_v35 }
 0x157   : > { %1752 = vst [vmem:[%s2927_s30] sm:$0xff] %v1736_v41  ;;  %v1739_v51 = vmax.f32 %v1723_v20, 0.0  ;;  %v1721_v22 = vadd.f32 %v2911_v11, %v1698_v8  ;;  %v1703_v44 = vadd.f32 %v2323_v16, %v1537_v55  ;;  %v1535_v26 = vadd.f32 %v1484_v54, %v1369_v25  ;;  %v2324_v59 = vpop.f32.mrf.mxu0  ;;  %v3048_v20 = vld [vmem:[#allocation7_spill] sm:$0xff]  ;;  %v3049_v55 = vld [vmem:[#allocation4_spill] sm:$0xff] }
 0x158   : > { %v2306_v31 = vpop.f32.mrf.mxu1  ;;  %v1205_v16 = vadd.f32 %v3047_v15, %v1039_v49  ;;  %v1042_v8 = vadd.f32 %v3048_v20, %v876_v1  ;;  %v1210_v12 = vadd.f32 %v2876_v28, %v1044_v4  ;;  %v1045_v24 = vadd.f32 %v3052_v6, %v879_v21 }
 0x159   : > { %1755 = vst [vmem:[%s2927_s30 + $0x18] sm:$0xff] %v1739_v51  ;;  %v1737_v38 = vmax.f32 %v1721_v22, 0.0  ;;  %v1726_v7 = vadd.f32 %v2911_v11, %v1703_v44  ;;  %v1701_v23 = vadd.f32 %v1650_v36, %v1535_v26  ;;  %v1538_v29 = vadd.f32 %v2306_v31, %v1372_v17  ;;  %v1653_v14 = vpop.f32.mrf.mxu0  ;;  %v3050_v36 = vld [vmem:[#allocation12_spill] sm:$0xff] }
 0x15a   : > { %v1487_v33 = vpop.f32.mrf.mxu1  ;;  %v877_v42 = vadd.f32 %v3050_v36, %v3049_v55  ;;  %v1376_v17 = vadd.f32 %v3051_v19, %v1207_v61  ;;  %v1208_v35 = vadd.f32 %v2882_v40, %v1042_v8  ;;  %v1379_v49 = vadd.f32 %v2874_v58, %v1210_v12 }
 0x15b   : > { %1753 = vst [vmem:[%s2927_s30 + $0x8] sm:$0xff] %v1737_v38  ;;  %v1742_v18 = vmax.f32 %v1726_v7, 0.0  ;;  %v1724_v48 = vadd.f32 %v2911_v11, %v1701_v23  ;;  %v1704_v5 = vadd.f32 %v2324_v59, %v1538_v29  ;;  %v1536_v62 = vadd.f32 %v1487_v33, %v1370_v47  ;;  %v2327_v45 = vpop.f32.mrf.mxu0  ;;  %v3053_v47 = vld [vmem:[#allocation18_spill] sm:$0xff] }
 0x15c   : > { %v2309_v57 = vpop.f32.mrf.mxu1  ;;  %v1374_v30 = vadd.f32 %v3053_v47, %v1205_v16  ;;  %v1211_v10 = vadd.f32 %v2890_v3, %v1045_v24  ;;  %v1377_v61 = vadd.f32 %v2880_v53, %v1208_v35 }
 0x15d   : > { %1758 = vst [vmem:[%s2927_s30 + $0x30] sm:$0xff] %v1742_v18  ;;  %v1740_v43 = vmax.f32 %v1724_v48, 0.0  ;;  %v1727_v25 = vadd.f32 %v2911_v11, %v1704_v5  ;;  %v1702_v50 = vadd.f32 %v1653_v14, %v1536_v62  ;;  %v1541_v60 = vadd.f32 %v2309_v57, %v1375_v52  ;;  %v1666_v41 = vpop.f32.mrf.mxu0  ;;  %v3054_v14 = vld [vmem:[#allocation11_spill] sm:$0xff] }
 0x15e   : > { %v1500_v54 = vpop.f32.mrf.mxu1  ;;  %v1043_v34 = vadd.f32 %v3054_v14, %v877_v42 }
 0x15f   : > { %1756 = vst [vmem:[%s2927_s30 + $0x20] sm:$0xff] %v1740_v43  ;;  %v1743_v51 = vmax.f32 %v1727_v25, 0.0  ;;  %v1725_v22 = vadd.f32 %v2911_v11, %v1702_v50  ;;  %v1707_v44 = vadd.f32 %v2327_v45, %v1541_v60  ;;  %v1539_v26 = vadd.f32 %v1500_v54, %v1373_v56  ;;  %v2328_v59 = vpop.f32.mrf.mxu0 }
 0x160   : > { %v2310_v31 = vpop.f32.mrf.mxu1  ;;  %v1209_v33 = vadd.f32 %v2897_v2, %v1043_v34  ;;  %v1380_v45 = vadd.f32 %v2886_v37, %v1211_v10 }
 0x161   : > { %1759 = vst [vmem:[%s2927_s30 + $0x38] sm:$0xff] %v1743_v51  ;;  %v1741_v38 = vmax.f32 %v1725_v22, 0.0  ;;  %v1730_v28 = vadd.f32 %v2911_v11, %v1707_v44  ;;  %v1705_v7 = vadd.f32 %v1666_v41, %v1539_v26  ;;  %v1542_v23 = vadd.f32 %v2310_v31, %v1376_v17  ;;  %v1669_v29 = vpop.f32.mrf.mxu0 }
 0x162   : > { %v1503_v27 = vpop.f32.mrf.mxu1  ;;  %v1378_v2 = vadd.f32 %v2893_v63, %v1209_v33 }
 0x163   : > { %1757 = vst [vmem:[%s2927_s30 + $0x28] sm:$0xff] %v1741_v38  ;;  %v1746_v1 = vmax.f32 %v1730_v28, 0.0  ;;  %v1728_v40 = vadd.f32 %v2911_v11, %v1705_v7  ;;  %v1708_v0 = vadd.f32 %v2328_v59, %v1542_v23  ;;  %v1540_v52 = vadd.f32 %v1503_v27, %v1374_v30  ;;  %v2331_v32 = vpop.f32.mrf.mxu0 }
 0x164   : > { %v2313_v18 = vpop.f32.mrf.mxu1 }
 0x165   : > { %1762 = vst [vmem:[%s2927_s30 + $0x50] sm:$0xff] %v1746_v1  ;;  %v1744_v48 = vmax.f32 %v1728_v40, 0.0  ;;  %v1731_v58 = vadd.f32 %v2911_v11, %v1708_v0  ;;  %v1706_v3 = vadd.f32 %v1669_v29, %v1540_v52  ;;  %v1545_v5 = vadd.f32 %v2313_v18, %v1379_v49  ;;  %v1682_v62 = vpop.f32.mrf.mxu0 }
 0x166   : > { %v1516_v9 = vpop.f32.mrf.mxu1 }
 0x167   : > { %1760 = vst [vmem:[%s2927_s30 + $0x40] sm:$0xff] %v1744_v48  ;;  %v1747_v4 = vmax.f32 %v1731_v58, 0.0  ;;  %v1729_v13 = vadd.f32 %v2911_v11, %v1706_v3  ;;  %v1711_v53 = vadd.f32 %v2331_v32, %v1545_v5  ;;  %v1543_v39 = vadd.f32 %v1516_v9, %v1377_v61  ;;  %v2332_v46 = vpop.f32.mrf.mxu0 }
 0x168   : > { %v2314_v21 = vpop.f32.mrf.mxu1 }
 0x169   : > { %1763 = vst [vmem:[%s2927_s30 + $0x58] sm:$0xff] %v1747_v4  ;;  %v1745_v56 = vmax.f32 %v1729_v13, 0.0  ;;  %v1734_v15 = vadd.f32 %v2911_v11, %v1711_v53  ;;  %v1709_v16 = vadd.f32 %v1682_v62, %v1543_v39  ;;  %v1546_v37 = vadd.f32 %v2314_v21, %v1380_v45  ;;  %v1685_v41 = vpop.f32.mrf.mxu0 }
 0x16a   : > { %v1519_v57 = vpop.f32.mrf.mxu1 }
 0x16b   : > { %1761 = vst [vmem:[%s2927_s30 + $0x48] sm:$0xff] %v1745_v56  ;;  %v1750_v43 = vmax.f32 %v1734_v15, 0.0  ;;  %v1732_v25 = vadd.f32 %v2911_v11, %v1709_v16  ;;  %v1712_v50 = vadd.f32 %v2332_v46, %v1546_v37  ;;  %v1544_v60 = vadd.f32 %v1519_v57, %v1378_v2 }
 0x16d   : > { %1766 = vst [vmem:[%s2927_s30 + $0x70] sm:$0xff] %v1750_v43  ;;  %v1748_v63 = vmax.f32 %v1732_v25, 0.0  ;;  %v1735_v20 = vadd.f32 %v2911_v11, %v1712_v50  ;;  %v1710_v8 = vadd.f32 %v1685_v41, %v1544_v60 }
 0x16f   : > { %1764 = vst [vmem:[%s2927_s30 + $0x60] sm:$0xff] %v1748_v63  ;;  %v1751_v55 = vmax.f32 %v1735_v20, 0.0  ;;  %v1733_v36 = vadd.f32 %v2911_v11, %v1710_v8 }
 0x171   : > { %1767 = vst [vmem:[%s2927_s30 + $0x78] sm:$0xff] %v1751_v55  ;;  %v1749_v42 = vmax.f32 %v1733_v36, 0.0 }
 0x173   : > { %1765 = vst [vmem:[%s2927_s30 + $0x68] sm:$0xff] %v1749_v42 }
 0x174 PF: > { %s13_s16 = sadd.s32 1, %s2424_s16   ;;  %s3055_s12 = smov %s2416_s14 }
 0x175   : > { %p10_p7 = scmp.ge.s32.totalorder %s13_s16, 6   ;;  %s3056_s13 = smov %s2420_s15 }
 0x176   : > { %s3057_s14 = smov %s3060_s17  ;;  %s3058_s15 = smov %s3064_s18 }
 0x177   :  { %12 = sbr.rel (!%p10_p7) target bundleno = 3 (0x3), region = 79 }

</bundles_post_ra>
